<compile_context>
chip_gen: v6e
topology: v6e:2x2x1
jax: 0.10.0
libtpu: 0.0.40
codegen_flags: <defaults>
</compile_context>

<pallas_src>
import functools

import jax
import jax.numpy as jnp
from jax.experimental import pallas as pl
from jax.experimental.pallas import tpu as pltpu


# --------------------------------------------------------------------------
# Fused multi-head self-attention kernel (one grid step == one batch element)
# --------------------------------------------------------------------------

def _mhsa_kernel(x_ref, wqkv_ref, wo_ref, b_ref, o_ref, *,
                 num_heads, dim_head, compute_dtype):
    inner = num_heads * dim_head
    x = x_ref[...]                                                    # [N, dim] bf16

    # One wide matmul produces Q, K, V for ALL heads: [N, 3*H*Dh].
    # (softmax scale is pre-folded into the Q columns of wqkv in the wrapper)
    qkv = jnp.dot(x, wqkv_ref[...],
                  preferred_element_type=jnp.float32).astype(compute_dtype)

    o_parts = []
    for h in range(num_heads):                       # static unrolled per-head loop
        q_h = qkv[:, h * dim_head:(h + 1) * dim_head]                          # [N, Dh]
        k_h = qkv[:, inner + h * dim_head: inner + (h + 1) * dim_head]         # [N, Dh]
        v_h = qkv[:, 2 * inner + h * dim_head: 2 * inner + (h + 1) * dim_head] # [N, Dh]

        # scores = q_h k_h^T  (contract Dh on both operands; scale already folded in)
        s = jax.lax.dot_general(q_h, k_h, (((1,), (1,)), ((), ())),
                                preferred_element_type=jnp.float32)  # [N, N] f32
        s = s - jnp.max(s, axis=-1, keepdims=True)                   # stable softmax
        e = jnp.exp(s)
        denom = jnp.sum(e, axis=-1, keepdims=True)                   # [N, 1]

        # Deferred normalization: matmul the un-normalized probabilities, then a
        # cheap [N,Dh] multiply by the EUP approximate reciprocal of the row sums.
        o_h = jnp.dot(e.astype(compute_dtype), v_h,
                      preferred_element_type=jnp.float32)            # [N, Dh] f32
        o_h = o_h * pl.reciprocal(denom, approx=True)
        o_parts.append(o_h.astype(compute_dtype))

    # concat over heads + output Linear as ONE wide matmul, epilogue runs once.
    o_cat = jnp.concatenate(o_parts, axis=-1)                        # [N, H*Dh] bf16
    y = jnp.dot(o_cat, wo_ref[...],
                preferred_element_type=jnp.float32) + b_ref[...]     # [N, dim] f32
    o_ref[...] = y.astype(o_ref.dtype)


def self_attention_forward(params, x, *, num_heads, dim_head,
                           compute_dtype=jnp.bfloat16):
    """x: [B, N, dim] (f32) -> [B, N, dim] (f32)."""
    B, N, dim = x.shape
    inner = num_heads * dim_head
    scale = float(dim_head) ** -0.5

    # PyTorch Linear layout: W_qkv [3*inner, dim] (no bias), W_out [dim, inner], b [dim].
    # Fold the softmax scale into the Q rows at trace time (free; 0.25 is exact in bf16).
    w_qkv = params["w_qkv"].at[:inner, :].multiply(scale)
    wqkv = w_qkv.T.astype(compute_dtype)                    # [dim, 3*inner]
    wo = params["w_out"].T.astype(compute_dtype)            # [inner, dim]
    bias = params["b_out"].reshape(1, dim).astype(jnp.float32)
    xc = x.astype(compute_dtype)

    return pl.pallas_call(
        functools.partial(_mhsa_kernel, num_heads=num_heads, dim_head=dim_head,
                          compute_dtype=compute_dtype),
        out_shape=jax.ShapeDtypeStruct((B, N, dim), jnp.float32),
        grid=(B,),                                           # batch is the only (parallel) axis
        in_specs=[
            pl.BlockSpec((None, N, dim), lambda b: (b, 0, 0)),   # x[b]
            pl.BlockSpec((dim, 3 * inner), lambda b: (0, 0)),    # W_qkv  (batch-invariant -> resident)
            pl.BlockSpec((inner, dim), lambda b: (0, 0)),        # W_out  (batch-invariant -> resident)
            pl.BlockSpec((1, dim), lambda b: (0, 0)),            # bias
        ],
        out_specs=pl.BlockSpec((None, N, dim), lambda b: (b, 0, 0)),
        compiler_params=pltpu.CompilerParams(
            dimension_semantics=("parallel",)),
    )(xc, wqkv, wo, bias)


# --------------------------------------------------------------------------
# Deterministic parameters (PyTorch Linear layout)
# --------------------------------------------------------------------------

def init_params(key, dim, num_heads, dim_head):
    inner = num_heads * dim_head
    k1, k2, k3 = jax.random.split(key, 3)
    bound_qkv = 1.0 / (dim ** 0.5)
    bound_out = 1.0 / (inner ** 0.5)
    w_qkv = jax.random.uniform(k1, (3 * inner, dim), jnp.float32, -bound_qkv, bound_qkv)
    w_out = jax.random.uniform(k2, (dim, inner), jnp.float32, -bound_out, bound_out)
    b_out = jax.random.uniform(k3, (dim,), jnp.float32, -bound_out, bound_out)
    return {"w_qkv": w_qkv, "w_out": w_out, "b_out": b_out}


# --------------------------------------------------------------------------
# Pure-JAX reference (mirrors the torch forward, same bf16 operand casts)
# --------------------------------------------------------------------------

def reference_forward(x, w_qkv, w_out, b_out, num_heads, dim_head,
                      compute_dtype=jnp.bfloat16):
    B, N, dim = x.shape
    scale = float(dim_head) ** -0.5
    cd = compute_dtype
    qkv = jnp.einsum("bnd,ed->bne", x.astype(cd), w_qkv.astype(cd),
                     preferred_element_type=jnp.float32)          # [B, N, 3*H*Dh]
    q, k, v = jnp.split(qkv, 3, axis=-1)

    def split_heads(t):   # 'b n (h d) -> b h n d'
        return t.reshape(B, N, num_heads, dim_head).transpose(0, 2, 1, 3)

    q, k, v = map(split_heads, (q, k, v))
    s = jnp.einsum("bhnd,bhmd->bhnm", q.astype(cd), k.astype(cd),
                   preferred_element_type=jnp.float32) * scale
    att = jax.nn.softmax(s, axis=-1)
    o = jnp.einsum("bhnm,bhmd->bhnd", att.astype(cd), v.astype(cd),
                   preferred_element_type=jnp.float32)
    o = o.transpose(0, 2, 1, 3).reshape(B, N, num_heads * dim_head)  # 'b h n d -> b n (h d)'
    return jnp.einsum("bne,de->bnd", o.astype(cd), w_out.astype(cd),
                      preferred_element_type=jnp.float32) + b_out


# --------------------------------------------------------------------------
# Demo
# --------------------------------------------------------------------------

if __name__ == "__main__":
    B, N, DIM = 2, 8, 32          # batch, seq, model dim
    H, DH = 4, 16                 # num_heads, dim_head_output

    key = jax.random.PRNGKey(0)
    pkey, xkey = jax.random.split(key)
    params = init_params(pkey, DIM, H, DH)
    x = jax.random.normal(xkey, (B, N, DIM), jnp.float32)

    fwd = jax.jit(functools.partial(self_attention_forward,
                                    num_heads=H, dim_head=DH))
    out = jax.block_until_ready(fwd(params, x))
    assert out.shape == (B, N, DIM) and out.dtype == jnp.float32

    ref = jax.block_until_ready(
        reference_forward(x, params["w_qkv"], params["w_out"], params["b_out"], H, DH))
    max_err = float(jnp.max(jnp.abs(out - ref)))
    assert max_err < 5e-2, f"mismatch vs reference: max abs err = {max_err}"

    print("KERNEL_OK")
</pallas_src>

<mosaic_0001>
module attributes {stable_mosaic.version = 11 : i64} {
  func.func @_mhsa_kernel(%arg0: i32, %arg1: memref<1x8x32xbf16, #tpu.memory_space<vmem>>, %arg2: memref<32x192xbf16, #tpu.memory_space<vmem>>, %arg3: memref<64x32xbf16, #tpu.memory_space<vmem>>, %arg4: memref<1x32xf32, #tpu.memory_space<vmem>>, %arg5: memref<1x8x32xf32, #tpu.memory_space<vmem>>) attributes {dimension_semantics = [#tpu.dimension_semantics<parallel>], iteration_bounds = array<i64: 2>, scalar_prefetch = 0 : i64, scratch_operands = 0 : i64, tpu.core_type = #tpu.core_type<tc>, window_params = [{transform_indices = @transform_0, window_bounds = array<i64: 1, 8, 32>}, {pipeline_mode = #tpu.pipeline_mode<synchronous>, transform_indices = @transform_1, window_bounds = array<i64: 32, 192>}, {pipeline_mode = #tpu.pipeline_mode<synchronous>, transform_indices = @transform_2, window_bounds = array<i64: 64, 32>}, {pipeline_mode = #tpu.pipeline_mode<synchronous>, transform_indices = @transform_3, window_bounds = array<i64: 1, 32>}, {transform_indices = @transform_4, window_bounds = array<i64: 1, 8, 32>}]} {
    %c0 = arith.constant 0 : index
    %c0_0 = arith.constant 0 : index
    %c0_1 = arith.constant 0 : index
    %0 = vector.load %arg1[%c0, %c0_0, %c0_1] : memref<1x8x32xbf16, #tpu.memory_space<vmem>>, vector<1x8x32xbf16>
    %1 = vector.shape_cast %0 : vector<1x8x32xbf16> to vector<8x32xbf16>
    %c0_2 = arith.constant 0 : index
    %c0_3 = arith.constant 0 : index
    %2 = vector.load %arg2[%c0_2, %c0_3] : memref<32x192xbf16, #tpu.memory_space<vmem>>, vector<32x192xbf16>
    %cst = arith.constant dense<0.000000e+00> : vector<8x192xf32>
    %3 = tpu.matmul %1, %2, %cst {dimension_numbers = #tpu.dot_dimension_numbers<[1], [0], [0], [1], [0, 0, 1, 1], [], []>} : vector<8x32xbf16>, vector<32x192xbf16>, vector<8x192xf32> -> vector<8x192xf32>
    %4 = arith.truncf %3 : vector<8x192xf32> to vector<8x192xbf16>
    %5 = vector.extract_strided_slice %4 {offsets = [0, 0], sizes = [8, 16], strides = [1, 1]} : vector<8x192xbf16> to vector<8x16xbf16>
    %6 = vector.extract_strided_slice %4 {offsets = [0, 64], sizes = [8, 16], strides = [1, 1]} : vector<8x192xbf16> to vector<8x16xbf16>
    %7 = vector.extract_strided_slice %4 {offsets = [0, 128], sizes = [8, 16], strides = [1, 1]} : vector<8x192xbf16> to vector<8x16xbf16>
    %cst_4 = arith.constant dense<0.000000e+00> : vector<8x8xf32>
    %8 = tpu.matmul %5, %6, %cst_4 {dimension_numbers = #tpu.dot_dimension_numbers<[1], [1], [0], [0], [0, 0, 1, 0], [], []>} : vector<8x16xbf16>, vector<8x16xbf16>, vector<8x8xf32> -> vector<8x8xf32>
    %cst_5 = arith.constant dense<0xFF800000> : vector<8xf32>
    %9 = vector.multi_reduction <maximumf>, %8, %cst_5 [1] : vector<8x8xf32> to vector<8xf32>
    %10 = vector.shape_cast %9 : vector<8xf32> to vector<8x1xf32>
    %11 = vector.broadcast %10 : vector<8x1xf32> to vector<8x8xf32>
    %12 = arith.subf %8, %11 : vector<8x8xf32>
    %13 = math.exp %12 : vector<8x8xf32>
    %cst_6 = arith.constant dense<0.000000e+00> : vector<8xf32>
    %14 = vector.multi_reduction <add>, %13, %cst_6 [1] : vector<8x8xf32> to vector<8xf32>
    %15 = vector.shape_cast %14 : vector<8xf32> to vector<8x1xf32>
    %16 = arith.truncf %13 : vector<8x8xf32> to vector<8x8xbf16>
    %cst_7 = arith.constant dense<0.000000e+00> : vector<8x16xf32>
    %17 = tpu.matmul %16, %7, %cst_7 {dimension_numbers = #tpu.dot_dimension_numbers<[1], [0], [0], [1], [0, 0, 1, 1], [], []>} : vector<8x8xbf16>, vector<8x16xbf16>, vector<8x16xf32> -> vector<8x16xf32>
    %18 = tpu.reciprocal %15 {approx = true} : vector<8x1xf32> -> vector<8x1xf32>
    %19 = vector.broadcast %18 : vector<8x1xf32> to vector<8x16xf32>
    %20 = arith.mulf %17, %19 : vector<8x16xf32>
    %21 = arith.truncf %20 : vector<8x16xf32> to vector<8x16xbf16>
    %22 = vector.extract_strided_slice %4 {offsets = [0, 16], sizes = [8, 16], strides = [1, 1]} : vector<8x192xbf16> to vector<8x16xbf16>
    %23 = vector.extract_strided_slice %4 {offsets = [0, 80], sizes = [8, 16], strides = [1, 1]} : vector<8x192xbf16> to vector<8x16xbf16>
    %24 = vector.extract_strided_slice %4 {offsets = [0, 144], sizes = [8, 16], strides = [1, 1]} : vector<8x192xbf16> to vector<8x16xbf16>
    %cst_8 = arith.constant dense<0.000000e+00> : vector<8x8xf32>
    %25 = tpu.matmul %22, %23, %cst_8 {dimension_numbers = #tpu.dot_dimension_numbers<[1], [1], [0], [0], [0, 0, 1, 0], [], []>} : vector<8x16xbf16>, vector<8x16xbf16>, vector<8x8xf32> -> vector<8x8xf32>
    %cst_9 = arith.constant dense<0xFF800000> : vector<8xf32>
    %26 = vector.multi_reduction <maximumf>, %25, %cst_9 [1] : vector<8x8xf32> to vector<8xf32>
    %27 = vector.shape_cast %26 : vector<8xf32> to vector<8x1xf32>
    %28 = vector.broadcast %27 : vector<8x1xf32> to vector<8x8xf32>
    %29 = arith.subf %25, %28 : vector<8x8xf32>
    %30 = math.exp %29 : vector<8x8xf32>
    %cst_10 = arith.constant dense<0.000000e+00> : vector<8xf32>
    %31 = vector.multi_reduction <add>, %30, %cst_10 [1] : vector<8x8xf32> to vector<8xf32>
    %32 = vector.shape_cast %31 : vector<8xf32> to vector<8x1xf32>
    %33 = arith.truncf %30 : vector<8x8xf32> to vector<8x8xbf16>
    %cst_11 = arith.constant dense<0.000000e+00> : vector<8x16xf32>
    %34 = tpu.matmul %33, %24, %cst_11 {dimension_numbers = #tpu.dot_dimension_numbers<[1], [0], [0], [1], [0, 0, 1, 1], [], []>} : vector<8x8xbf16>, vector<8x16xbf16>, vector<8x16xf32> -> vector<8x16xf32>
    %35 = tpu.reciprocal %32 {approx = true} : vector<8x1xf32> -> vector<8x1xf32>
    %36 = vector.broadcast %35 : vector<8x1xf32> to vector<8x16xf32>
    %37 = arith.mulf %34, %36 : vector<8x16xf32>
    %38 = arith.truncf %37 : vector<8x16xf32> to vector<8x16xbf16>
    %39 = vector.extract_strided_slice %4 {offsets = [0, 32], sizes = [8, 16], strides = [1, 1]} : vector<8x192xbf16> to vector<8x16xbf16>
    %40 = vector.extract_strided_slice %4 {offsets = [0, 96], sizes = [8, 16], strides = [1, 1]} : vector<8x192xbf16> to vector<8x16xbf16>
    %41 = vector.extract_strided_slice %4 {offsets = [0, 160], sizes = [8, 16], strides = [1, 1]} : vector<8x192xbf16> to vector<8x16xbf16>
    %cst_12 = arith.constant dense<0.000000e+00> : vector<8x8xf32>
    %42 = tpu.matmul %39, %40, %cst_12 {dimension_numbers = #tpu.dot_dimension_numbers<[1], [1], [0], [0], [0, 0, 1, 0], [], []>} : vector<8x16xbf16>, vector<8x16xbf16>, vector<8x8xf32> -> vector<8x8xf32>
    %cst_13 = arith.constant dense<0xFF800000> : vector<8xf32>
    %43 = vector.multi_reduction <maximumf>, %42, %cst_13 [1] : vector<8x8xf32> to vector<8xf32>
    %44 = vector.shape_cast %43 : vector<8xf32> to vector<8x1xf32>
    %45 = vector.broadcast %44 : vector<8x1xf32> to vector<8x8xf32>
    %46 = arith.subf %42, %45 : vector<8x8xf32>
    %47 = math.exp %46 : vector<8x8xf32>
    %cst_14 = arith.constant dense<0.000000e+00> : vector<8xf32>
    %48 = vector.multi_reduction <add>, %47, %cst_14 [1] : vector<8x8xf32> to vector<8xf32>
    %49 = vector.shape_cast %48 : vector<8xf32> to vector<8x1xf32>
    %50 = arith.truncf %47 : vector<8x8xf32> to vector<8x8xbf16>
    %cst_15 = arith.constant dense<0.000000e+00> : vector<8x16xf32>
    %51 = tpu.matmul %50, %41, %cst_15 {dimension_numbers = #tpu.dot_dimension_numbers<[1], [0], [0], [1], [0, 0, 1, 1], [], []>} : vector<8x8xbf16>, vector<8x16xbf16>, vector<8x16xf32> -> vector<8x16xf32>
    %52 = tpu.reciprocal %49 {approx = true} : vector<8x1xf32> -> vector<8x1xf32>
    %53 = vector.broadcast %52 : vector<8x1xf32> to vector<8x16xf32>
    %54 = arith.mulf %51, %53 : vector<8x16xf32>
    %55 = arith.truncf %54 : vector<8x16xf32> to vector<8x16xbf16>
    %56 = vector.extract_strided_slice %4 {offsets = [0, 48], sizes = [8, 16], strides = [1, 1]} : vector<8x192xbf16> to vector<8x16xbf16>
    %57 = vector.extract_strided_slice %4 {offsets = [0, 112], sizes = [8, 16], strides = [1, 1]} : vector<8x192xbf16> to vector<8x16xbf16>
    %58 = vector.extract_strided_slice %4 {offsets = [0, 176], sizes = [8, 16], strides = [1, 1]} : vector<8x192xbf16> to vector<8x16xbf16>
    %cst_16 = arith.constant dense<0.000000e+00> : vector<8x8xf32>
    %59 = tpu.matmul %56, %57, %cst_16 {dimension_numbers = #tpu.dot_dimension_numbers<[1], [1], [0], [0], [0, 0, 1, 0], [], []>} : vector<8x16xbf16>, vector<8x16xbf16>, vector<8x8xf32> -> vector<8x8xf32>
    %cst_17 = arith.constant dense<0xFF800000> : vector<8xf32>
    %60 = vector.multi_reduction <maximumf>, %59, %cst_17 [1] : vector<8x8xf32> to vector<8xf32>
    %61 = vector.shape_cast %60 : vector<8xf32> to vector<8x1xf32>
    %62 = vector.broadcast %61 : vector<8x1xf32> to vector<8x8xf32>
    %63 = arith.subf %59, %62 : vector<8x8xf32>
    %64 = math.exp %63 : vector<8x8xf32>
    %cst_18 = arith.constant dense<0.000000e+00> : vector<8xf32>
    %65 = vector.multi_reduction <add>, %64, %cst_18 [1] : vector<8x8xf32> to vector<8xf32>
    %66 = vector.shape_cast %65 : vector<8xf32> to vector<8x1xf32>
    %67 = arith.truncf %64 : vector<8x8xf32> to vector<8x8xbf16>
    %cst_19 = arith.constant dense<0.000000e+00> : vector<8x16xf32>
    %68 = tpu.matmul %67, %58, %cst_19 {dimension_numbers = #tpu.dot_dimension_numbers<[1], [0], [0], [1], [0, 0, 1, 1], [], []>} : vector<8x8xbf16>, vector<8x16xbf16>, vector<8x16xf32> -> vector<8x16xf32>
    %69 = tpu.reciprocal %66 {approx = true} : vector<8x1xf32> -> vector<8x1xf32>
    %70 = vector.broadcast %69 : vector<8x1xf32> to vector<8x16xf32>
    %71 = arith.mulf %68, %70 : vector<8x16xf32>
    %72 = arith.truncf %71 : vector<8x16xf32> to vector<8x16xbf16>
    %73 = tpu.concatenate %21, %38, %55, %72 in 1 : vector<8x16xbf16>, vector<8x16xbf16>, vector<8x16xbf16>, vector<8x16xbf16> -> vector<8x64xbf16>
    %c0_20 = arith.constant 0 : index
    %c0_21 = arith.constant 0 : index
    %74 = vector.load %arg3[%c0_20, %c0_21] : memref<64x32xbf16, #tpu.memory_space<vmem>>, vector<64x32xbf16>
    %cst_22 = arith.constant dense<0.000000e+00> : vector<8x32xf32>
    %75 = tpu.matmul %73, %74, %cst_22 {dimension_numbers = #tpu.dot_dimension_numbers<[1], [0], [0], [1], [0, 0, 1, 1], [], []>} : vector<8x64xbf16>, vector<64x32xbf16>, vector<8x32xf32> -> vector<8x32xf32>
    %c0_23 = arith.constant 0 : index
    %c0_24 = arith.constant 0 : index
    %76 = vector.load %arg4[%c0_23, %c0_24] : memref<1x32xf32, #tpu.memory_space<vmem>>, vector<1x32xf32>
    %77 = vector.broadcast %76 : vector<1x32xf32> to vector<8x32xf32>
    %78 = arith.addf %75, %77 : vector<8x32xf32>
    %c0_25 = arith.constant 0 : index
    %c0_26 = arith.constant 0 : index
    %c0_27 = arith.constant 0 : index
    %79 = vector.load %arg5[%c0_25, %c0_26, %c0_27] : memref<1x8x32xf32, #tpu.memory_space<vmem>>, vector<1x8x32xf32>
    %80 = vector.shape_cast %79 : vector<1x8x32xf32> to vector<8x32xf32>
    %81 = vector.shape_cast %78 : vector<8x32xf32> to vector<1x8x32xf32>
    tpu.vector_store %arg5[%c0_25, %c0_26, %c0_27], %81 {strides = array<i32>} : memref<1x8x32xf32, #tpu.memory_space<vmem>>, vector<1x8x32xf32>,
    return
  }
  func.func @transform_0(%arg0: i32) -> (i32, i32, i32) {
    %c0_i32 = arith.constant 0 : i32
    %c0_i32_0 = arith.constant 0 : i32
    %c0_i32_1 = arith.constant 0 : i32
    return %arg0, %c0_i32, %c0_i32_0 : i32, i32, i32
  }
  func.func @transform_1(%arg0: i32) -> (i32, i32) {
    %c0_i32 = arith.constant 0 : i32
    %c0_i32_0 = arith.constant 0 : i32
    %c0_i32_1 = arith.constant 0 : i32
    return %c0_i32, %c0_i32_0 : i32, i32
  }
  func.func @transform_2(%arg0: i32) -> (i32, i32) {
    %c0_i32 = arith.constant 0 : i32
    %c0_i32_0 = arith.constant 0 : i32
    %c0_i32_1 = arith.constant 0 : i32
    return %c0_i32, %c0_i32_0 : i32, i32
  }
  func.func @transform_3(%arg0: i32) -> (i32, i32) {
    %c0_i32 = arith.constant 0 : i32
    %c0_i32_0 = arith.constant 0 : i32
    %c0_i32_1 = arith.constant 0 : i32
    return %c0_i32, %c0_i32_0 : i32, i32
  }
  func.func @transform_4(%arg0: i32) -> (i32, i32, i32) {
    %c0_i32 = arith.constant 0 : i32
    %c0_i32_0 = arith.constant 0 : i32
    %c0_i32_1 = arith.constant 0 : i32
    return %arg0, %c0_i32, %c0_i32_0 : i32, i32, i32
  }
}

</mosaic_0001>

<bundles_post_ra>
// kernel: self_attention_forward.1
= control target key start
LH: loop header
LB: loop body
LE: loop exit
PB: predicated region body
PF: predicated region fallthrough
CT: control target
= control target key end

     0   :  { %9 = vsyncpa [#allocation3], 0  ;;  %s1369_s0 = inlined_call_operand.vmem [shape: bf16[2,8,32], index: 0, kind: input, shape index: {}]   ;;  %s1370_s1 = inlined_call_operand.vmem [shape: bf16[32,192], index: 1, kind: input, shape index: {}]   ;;  %s1371_s2 = inlined_call_operand.vmem [shape: bf16[64,32], index: 2, kind: input, shape index: {}]   ;;  %s1372_s3 = inlined_call_operand.vmem [shape: f32[1,32], index: 3, kind: input, shape index: {}]   ;;  %s1373_s4 = inlined_call_operand.hbm [shape: f32[2,8,32], index: 4, kind: output, shape index: {}]  }
   0x1   :  { %11 = vsyncpa [#allocation3 + $0x1], 0  ;;  %s1167_s15 = smov 0   ;;  %s1169_s16 = smov 0  }
   0x2   :  { %s1171_s17 = smov 0   ;;  %s1173_s18 = smov 0  }
   0x3 LB: > { %s1188_s19 = sadd.s32 4294967295, %s1129_s18   ;;  %s884_s20 = sadd.s32 4294967294, %s1129_s18   ;;  %s1129_s18 = sphi %s1173_s18, %s1379_s18   ;;  %s1125_s17 = sphi %s1171_s17, %s1378_s17   ;;  %s1121_s16 = sphi %s1169_s16, %s1377_s16   ;;  %s1117_s15 = sphi %s1167_s15, %s1376_s15  }
   0x4   : > { %s1192_s21 = sadd.s32 1, %s1129_s18   ;;  %s113_s22 = sadd.s32 1, %s1125_s17 }
   0x5   : > { %s110_s23 = ssub.s32 %s1129_s18, %s1192_s21  ;;  %p123_p0 = scmp.ne.s32.totalorder %s1125_s17, %s1121_s16 }
   0x6   : > { %p111_p1 = scmp.eq.s32.totalorder %s110_s23, 0  ;;  %p124_p2 = scmp.eq.s32.totalorder %s1188_s19, 1 }
   0x7   : > { %p129_p3 = scmp.ne.s32.totalorder %s1121_s16, %s1117_s15  ;;  %p130_p4 = scmp.eq.s32.totalorder %s884_s20, 1 }
   0x8   : > { %s1203_s24 = scalar_select %p111_p1, %s1125_s17, %s113_s22  }
   0x9   : > { %p1205_p5 = por %p124_p2, %p123_p0  ;;  %p1209_p6 = por %p130_p4, %p129_p3 }
   0xa   : > { %p887_p7 = scmp.ge.s32.totalorder %s1129_s18, 1  ;;  %p164_p8 = scmp.lt.s32.totalorder %s1129_s18, 3 }
   0xc   : > { %p165_p9 = pnand %p887_p7, %p164_p8 }
   0xd   : > { %p189_p10 = scmp.lt.s32.totalorder (!%p165_p9), %s1188_s19, 1  ;;  %s1134_s14 = smov (!%p165_p9), 112  }
   0xe   : > { %168 = sbr.rel (%p165_p9) target bundleno = 1273 (0x4f9), region = 36  ;;  %s1135_s20 = smov (!%p165_p9), 64  }
   0xf   : > { %s1136_s22 = smov (!%p165_p9), 32   ;;  %s1137_s23 = smov (!%p165_p9), 48  }
  0x10   : > { %s1138_s27 = smov (!%p165_p9), 16   ;;  %s1139_s28 = smov (!%p165_p9), 96  }
  0x11   : > { %s1140_s29 = smov (!%p165_p9), 80   ;;  %s186_s12 = sand.u32 (!%p165_p9), 1, %s1121_s16  }
  0x12   : > { %s812_s5 = scalar_lea.sflag (!%p165_p9), [#allocation3], %s186_s12  ;;  %s1141_s6 = smov (!%p165_p9), [#allocation2]  }
  0x13   : > { %v1043_v0 = vld [vmem:[%s1370_s1 + $0x14] ss:$8 sps:$4 sm:$0xff]   ;;  %v1045_v1 = vld [vmem:[%s1370_s1 + $0x10] ss:$8 sps:$4 sm:$0xff]   ;;  %v1131_v2 = vmov 0   ;;  %s190_s9 = scalar_select %p189_p10, %s1188_s19, 1 }
  0x14   : > { %255 = vmatprep.mubr.bf16.mxu0 %v1131_v2  ;;  %235 = vmatprep.subr.bf16.mxu0 %v1043_v0  ;;  %v1046_v3 = vld [vmem:[%s1370_s1 + $0x4] ss:$8 sps:$4 sm:$0xff]   ;;  %v1048_v4 = vld [vmem:[%s1370_s1] ss:$8 sps:$4 sm:$0xff]   ;;  %vm219_vm0 = vcmask 261120   ;;  %v1132_v6 = vmov 0.0  }
  0x15   : > { %236 = vmatpush1.bf16.msra.mxu0 %v1045_v1  ;;  %s889_s10 = sshll.u32 %s190_s9, 2  ;;  %934 = vmatprep.subr.bf16.mxu1 %v1132_v6  ;;  %vm1133_vm1 = vmmov 0   ;;  %vm330_vm2 = vcmask 1043456   ;;  %vm269_vm3 = vcmask 130048   ;;  %vm316_vm4 = vcmask 64512   ;;  %s1073_s7 = sshll.u32 %s1141_s6, 4  ;;  %s1074_s7 = int_to_ptr.vmem [resolvable:$false] %s1073_s7 }
  0x16   : > { %237 = vmatprep.subr.bf16.mxu0 %v1046_v3  ;;  %s192_s13 = scalar_lea.vmem %s1369_s0, %s889_s10  ;;  %936 = vmatprep.mubr.msk.bf16.mxu1 %vm1133_vm1, %v1132_v6  ;;  %vm725_vm5 = vcmask 392192   ;;  %vm767_vm6 = vcmask 523264   ;;  %s1075_s8 = scalar_lea.vmem %s1074_s7, 256 }
  0x17   : > { %v194_v5 = vld [vmem:[%s192_s13] sm:$0xf]  ;;  %s888_s13 = sshll.u32 %s186_s12, 3 }
  0x19   : > { %238 = vmatpush1.bf16.msra.mxu0 %v1048_v4 }
  0x1a   : > { %940 = vmatprep.subr.bf16.mxu0 %v1132_v6 }
  0x1c   : > { %894 = vmatmul.mubr.msk.bf16.vlgmr.msra.gmra.mxu0 %vm219_vm0, %v194_v5 }
  0x1d   : > { %942 = vmatprep.mubr.msk.bf16.mxu0 %vm1133_vm1, %v1132_v6 }
  0xdc   : > { %v257_v7 = vpop.f32.mrf.mxu0 }
  0xdd   : > { %v264_v8 = vpack.c.bf16 %v257_v7, %v257_v7 }
  0xde   : > { %v259_v9 = vpop.f32.mrf.mxu0 }
  0xdf   : > { %v1239_v10 = vpack.c.bf16 %v259_v9, %v259_v9  ;;  %377 = vrot.lane.b32.xlu1 %v264_v8, %s1134_s14  ;;  %267 = vrot.lane.b32.xlu0 %v264_v8, %s1135_s20 }
  0xe0   : > { %v261_v11 = vpop.f32.mrf.mxu0 }
  0xe1   : > { %v332_v12 = vsel %vm330_vm2, %v1239_v10, 0 }
  0xe2   : > { %v262_v13 = vpop.f32.mrf.mxu0  ;;  %941 = vmatpush3.bf16.msra.mxu0 %v332_v12 }
  0xe3   : > { %491 = vrot.lane.b32.xlu1 %v264_v8, %s1136_s22  ;;  %379 = vrot.lane.b32.xlu0 %v264_v8, %s1137_s23 }
  0xe4   : > { %952 = vmatprep.subr.bf16.mxu0 %v1132_v6 }
  0xe7   : > { %602 = vrot.lane.b32.xlu1 %v264_v8, %s1138_s27  ;;  %489 = vrot.lane.b32.xlu0 %v264_v8, %s1139_s28 }
  0xeb   : > { %600 = vrot.lane.b32.xlu0 %v264_v8, %s1140_s29 }
 0x151   : > { %v268_v14 = vpop.permute.xlu0 %267  ;;  %v378_v17 = vpop.permute.xlu1 %377 }
 0x152   : > { %v274_v15 = vsel %vm269_vm3, %v268_v14, 0 }
 0x153   : > { %935 = vmatpush3.bf16.xpose.msra.mxu1 %v274_v15 }
 0x154   : > { %946 = vmatprep.subr.bf16.mxu1 %v1132_v6 }
 0x155   : > { %v380_v16 = vpop.permute.xlu0 %379  ;;  %v492_v19 = vpop.permute.xlu1 %491 }
 0x156   : > { %v385_v18 = vsel %vm269_vm3, %v380_v16, 0  ;;  %v497_v20 = vsel %vm269_vm3, %v492_v19, 0 }
 0x159   : > { %v603_v21 = vpop.permute.xlu1 %602  ;;  %v490_v22 = vpop.permute.xlu0 %489 }
 0x15a   : > { %937 = vmatmul.mubr.msk.bf16.vlgmr.msra.gmra.mxu1 %vm269_vm3, %v264_v8  ;;  %v608_v23 = vsel %vm269_vm3, %v603_v21, 0 }
 0x15b   : > { %947 = vmatpush3.bf16.xpose.msra.mxu1 %v385_v18  ;;  %948 = vmatprep.mubr.msk.bf16.mxu1 %vm1133_vm1, %v1132_v6 }
 0x15c   : > { %958 = vmatprep.subr.bf16.mxu1 %v1132_v6 }
 0x15d   : > { %v601_v24 = vpop.permute.xlu0 %600 }
 0x162   : > { %949 = vmatmul.mubr.msk.bf16.vlgmr.msra.gmra.mxu1 %vm269_vm3, %v378_v17 }
 0x163   : > { %959 = vmatpush3.bf16.xpose.msra.mxu1 %v497_v20  ;;  %960 = vmatprep.mubr.msk.bf16.mxu1 %vm1133_vm1, %v1132_v6  ;;  %v1049_v20 = vld [vmem:[%s1371_s2 + $0x18] sm:$0xff]  }
 0x164   : > { %970 = vmatprep.subr.bf16.mxu1 %v1132_v6 }
 0x16a   : > { %961 = vmatmul.mubr.msk.bf16.vlgmr.msra.gmra.mxu1 %vm269_vm3, %v490_v22 }
 0x16b   : > { %971 = vmatpush3.bf16.xpose.msra.mxu1 %v608_v23  ;;  %972 = vmatprep.mubr.msk.bf16.mxu1 %vm1133_vm1, %v1132_v6  ;;  %v1050_v23 = vld [vmem:[%s1371_s2 + $0x10] sm:$0xff]  }
 0x16c   : > { %982 = vmatprep.subr.bf16.mxu1 %v1132_v6 }
 0x172   : > { %973 = vmatmul.mubr.msk.bf16.vlgmr.msra.gmra.mxu1 %vm269_vm3, %v601_v24 }
 0x173   : > { %990 = vmatprep.mubr.msk.bf16.mxu1 %vm1133_vm1, %v1132_v6  ;;  %983 = vmatpush3.bf16.msra.mxu1 %v1049_v20 }
 0x174   : > { %984 = vmatprep.subr.bf16.mxu1 %v1132_v6 }
 0x177   : > { %985 = vmatpush3.bf16.msra.mxu1 %v1050_v23 }
 0x178   : > { %986 = vmatprep.subr.bf16.mxu1 %v1132_v6 }
 0x21a   : > { %v310_v25 = vpop.f32.mrf.mxu1 }
 0x21b   : > { %v317_v26 = vsel %vm316_vm4, %v310_v25, -inf }
 0x21c   : > { %318 = vmax.xlane.f32.xlu1 %v317_v26  ;;  %v938_v27 = vpop.f32.mrf.mxu1 }
 0x21d   : > { %v1051_v27 = vld [vmem:[%s1371_s2 + $0x8] sm:$0xff]  }
 0x21e   : > { %v313_v28 = vpop.f32.mrf.mxu1  ;;  %987 = vmatpush3.bf16.msra.mxu1 %v1051_v27 }
 0x21f   : > { %988 = vmatprep.subr.bf16.mxu1 %v1132_v6 }
 0x220   : > { %v939_v29 = vpop.f32.mrf.mxu1 }
 0x222   : > { %v421_v30 = vpop.f32.mrf.mxu1 }
 0x223   : > { %v427_v31 = vsel %vm316_vm4, %v421_v30, -inf }
 0x224   : > { %428 = vmax.xlane.f32.xlu0 %v427_v31  ;;  %v950_v32 = vpop.f32.mrf.mxu1 }
 0x225   : > { %v1052_v32 = vld [vmem:[%s1371_s2] sm:$0xff]  }
 0x226   : > { %v424_v33 = vpop.f32.mrf.mxu1  ;;  %989 = vmatpush3.bf16.msra.mxu1 %v1052_v32 }
 0x228   : > { %v951_v34 = vpop.f32.mrf.mxu1 }
 0x22a   : > { %v533_v35 = vpop.f32.mrf.mxu1 }
 0x22b   : > { %v539_v36 = vsel %vm316_vm4, %v533_v35, -inf }
 0x22c   : > { %540 = vmax.xlane.f32.xlu0 %v539_v36  ;;  %v962_v37 = vpop.f32.mrf.mxu1 }
 0x22d   : > { %549 = vrot.lane.b32.xlu1 %v1239_v10, %s1139_s28 }
 0x22e   : > { %v536_v38 = vpop.f32.mrf.mxu1 }
 0x230   : > { %v963_v39 = vpop.f32.mrf.mxu1 }
 0x232   : > { %v644_v40 = vpop.f32.mrf.mxu1 }
 0x233   : > { %v650_v44 = vsel %vm316_vm4, %v644_v40, -inf }
 0x234   : > { %v974_v41 = vpop.f32.mrf.mxu1 }
 0x236   : > { %v647_v42 = vpop.f32.mrf.mxu1 }
 0x238   : > { %v975_v43 = vpop.f32.mrf.mxu1 }
 0x242   : > { %438 = vrot.lane.b32.xlu0 %v1239_v10, %s1134_s14 }
 0x251   : > { %651 = vmax.xlane.f32.xlu1 %v650_v44 }
 0x262   : > { %660 = vrot.lane.b32.xlu1 %v1239_v10, %s1140_s29 }
 0x2a5   : > { %v319_v45 = vpop.xlane.xlu1 %318 }
 0x2a6   : > { %v320_v46 = vsub.f32 %v310_v25, %v319_v45 }
 0x2a8   : > { %v321_v47 = vmul.f32 1.442695, %v320_v46 }
 0x2a9   : > { %v550_v59 = vpop.permute.xlu1 %549 }
 0x2aa   : > { %1053 = vpow2.f32 %v321_v47  ;;  %v555_v62 = vsel %vm330_vm2, %v550_v59, 0 }
 0x2ad   : > { %v429_v48 = vpop.xlane.xlu0 %428 }
 0x2ae   : > { %v430_v49 = vsub.f32 %v421_v30, %v429_v48 }
 0x2b0   : > { %v431_v50 = vmul.f32 1.442695, %v430_v49 }
 0x2b2   : > { %1055 = vpow2.f32 %v431_v50 }
 0x2b5   : > { %v541_v51 = vpop.xlane.xlu0 %540 }
 0x2b6   : > { %v542_v52 = vsub.f32 %v533_v35, %v541_v51 }
 0x2b7   : > { %v1054_v53 = vpop.eup %1053 }
 0x2b8   : > { %v543_v54 = vmul.f32 1.442695, %v542_v52  ;;  %v326_v55 = vpack.c.bf16 %v1054_v53, %v1054_v53  ;;  %v323_v11 = vsel %vm316_vm4, %v1054_v53, 0.0  ;;  %v903_v53 = vld [vmem:[%s1372_s3] ss:$0 sm:$0xff] }
 0x2b9   : > { %v439_v56 = vpop.permute.xlu0 %438 }
 0x2ba   : > { %1057 = vpow2.f32 %v543_v54  ;;  %v444_v57 = vsel %vm330_vm2, %v439_v56, 0  ;;  %943 = vmatmul.mubr.msk.bf16.vlgmr.msra.gmra.mxu0 %vm316_vm4, %v326_v55 }
 0x2bb   : > { %953 = vmatpush3.bf16.msra.mxu0 %v444_v57  ;;  %954 = vmatprep.mubr.msk.bf16.mxu0 %vm1133_vm1, %v1132_v6 }
 0x2bc   : > { %964 = vmatprep.subr.bf16.mxu0 %v1132_v6 }
 0x2bf   : > { %v1056_v58 = vpop.eup %1055 }
 0x2c0   : > { %v433_v60 = vsel %vm316_vm4, %v1056_v58, 0.0  ;;  %v436_v61 = vpack.c.bf16 %v1056_v58, %v1056_v58 }
 0x2c1   : > { %434 = vadd.xlane.f32.xlu0 %v433_v60 }
 0x2c2   : > { %955 = vmatmul.mubr.msk.bf16.vlgmr.msra.gmra.mxu0 %vm316_vm4, %v436_v61 }
 0x2c3   : > { %965 = vmatpush3.bf16.msra.mxu0 %v555_v62  ;;  %966 = vmatprep.mubr.msk.bf16.mxu0 %vm1133_vm1, %v1132_v6 }
 0x2c4   : > { %976 = vmatprep.subr.bf16.mxu0 %v1132_v6 }
 0x2c7   : > { %v1058_v63 = vpop.eup %1057 }
 0x2c8   : > { %v545_v0 = vsel %vm316_vm4, %v1058_v63, 0.0  ;;  %v548_v1 = vpack.c.bf16 %v1058_v63, %v1058_v63 }
 0x2c9   : > { %546 = vadd.xlane.f32.xlu1 %v545_v0 }
 0x2ca   : > { %967 = vmatmul.mubr.msk.bf16.vlgmr.msra.gmra.mxu0 %vm316_vm4, %v548_v1 }
 0x2cb   : > { %978 = vmatprep.mubr.msk.bf16.mxu0 %vm1133_vm1, %v1132_v6 }
 0x2da   : > { %v652_v2 = vpop.xlane.xlu1 %651 }
 0x2db   : > { %v653_v3 = vsub.f32 %v644_v40, %v652_v2 }
 0x2dd   : > { %v654_v4 = vmul.f32 1.442695, %v653_v3 }
 0x2de   : > { %v661_v5 = vpop.permute.xlu1 %660 }
 0x2df   : > { %1059 = vpow2.f32 %v654_v4  ;;  %v666_v7 = vsel %vm330_vm2, %v661_v5, 0 }
 0x2e0   : > { %977 = vmatpush3.bf16.msra.mxu0 %v666_v7 }
 0x2ec   : > { %v1060_v8 = vpop.eup %1059 }
 0x2ed   : > { %v656_v9 = vsel %vm316_vm4, %v1060_v8, 0.0  ;;  %v659_v10 = vpack.c.bf16 %v1060_v8, %v1060_v8 }
 0x2ee   : > { %657 = vadd.xlane.f32.xlu0 %v656_v9 }
 0x2ef   : > { %979 = vmatmul.mubr.msk.bf16.vlgmr.msra.gmra.mxu0 %vm316_vm4, %v659_v10 }
 0x2f2   : > { %324 = vadd.xlane.f32.xlu0 %v323_v11 }
 0x34a   : > { %v435_v12 = vpop.xlane.xlu0 %434 }
 0x34b   : > { %1061 = vrcp.f32 %v435_v12 }
 0x352   : > { %v547_v13 = vpop.xlane.xlu1 %546 }
 0x353   : > { %1063 = vrcp.f32 %v547_v13 }
 0x358   : > { %v1062_v18 = vpop.eup %1061 }
 0x360   : > { %v1064_v28 = vpop.eup %1063 }
 0x377   : > { %v658_v36 = vpop.xlane.xlu0 %657 }
 0x378   : > { %1065 = vrcp.f32 %v658_v36 }
 0x37a   : > { %v368_v14 = vpop.f32.mrf.mxu0 }
 0x37b   : > { %v325_v44 = vpop.xlane.xlu0 %324 }
 0x37c   : > { %v944_v15 = vpop.f32.mrf.mxu0  ;;  %1067 = vrcp.f32 %v325_v44 }
 0x37e   : > { %v371_v16 = vpop.f32.mrf.mxu0 }
 0x380   : > { %v945_v17 = vpop.f32.mrf.mxu0 }
 0x382   : > { %v480_v19 = vpop.f32.mrf.mxu0 }
 0x383   : > { %v487_v21 = vmul.f32 %v1062_v18, %v480_v19 }
 0x384   : > { %v956_v22 = vpop.f32.mrf.mxu0 }
 0x385   : > { %v488_v24 = vpack.c.bf16 %v487_v21, %v487_v21  ;;  %v1066_v37 = vpop.eup %1065 }
 0x386   : > { %v483_v25 = vpop.f32.mrf.mxu0 }
 0x387   : > { %712 = vrot.lane.b32.xlu1 %v488_v24, %s1138_s27 }
 0x388   : > { %v957_v26 = vpop.f32.mrf.mxu0 }
 0x389   : > { %v1068_v6 = vpop.eup %1067 }
 0x38a   : > { %v591_v29 = vpop.f32.mrf.mxu0  ;;  %v375_v45 = vmul.f32 %v1068_v6, %v368_v14 }
 0x38b   : > { %v598_v30 = vmul.f32 %v1064_v28, %v591_v29 }
 0x38c   : > { %v968_v31 = vpop.f32.mrf.mxu0  ;;  %v376_v47 = vpack.c.bf16 %v375_v45, %v375_v45 }
 0x38d   : > { %v599_v33 = vpack.c.bf16 %v598_v30, %v598_v30 }
 0x38e   : > { %v594_v34 = vpop.f32.mrf.mxu0 }
 0x38f   : > { %715 = vrot.lane.b32.xlu0 %v599_v33, %s1136_s22  ;;  %s910_s22 = sshll.u32 %s1188_s19, 7 }
 0x390   : > { %v969_v35 = vpop.f32.mrf.mxu0  ;;  %s1327_s30 = scalar_lea.hbm %s1373_s4, %s910_s22 }
 0x3af   : > { %v702_v38 = vpop.f32.mrf.mxu0 }
 0x3b0   : > { %v709_v39 = vmul.f32 %v1066_v37, %v702_v38 }
 0x3b1   : > { %v980_v40 = vpop.f32.mrf.mxu0 }
 0x3b2   : > { %v710_v41 = vpack.c.bf16 %v709_v39, %v709_v39 }
 0x3b3   : > { %v705_v42 = vpop.f32.mrf.mxu0 }
 0x3b4   : > { %718 = vrot.lane.b32.xlu1 %v710_v41, %s1137_s23  ;;  %s188_s23 = scalar_lea.vmem [#allocation2], %s888_s13 }
 0x3b5   : > { %v981_v43 = vpop.f32.mrf.mxu0  ;;  %s825_s27 = sshll.u32 %s188_s23, 4  ;;  %s1329_s27 = int_to_ptr.vmem [resolvable:$true] %s825_s27 }
 0x3b6   : > { %s1069_s19 = scalar_lea.vmem %s1329_s27, 128  ;;  %p1076_p0 = scmp.lt.s32.totalorder %s1329_s27, %s1074_s7 }
 0x3b7   : > { %p1070_p11 = scmp.ne.s32.totalorder %s1329_s27, %s1069_s19  ;;  %p1077_p1 = scmp.lt.s32.totalorder %s1075_s8, %s1069_s19 }
 0x3b9   : > { %p1071_p12 = pnand %p1070_p11, %p1205_p5  ;;  %p1078_p2 = por %p1077_p1, %p1076_p0 }
 0x3bb   : > { %p1072_p13 = pneg %p1071_p12 }
 0x3bd   : > { %p1079_p3 = pnand %p1078_p2, %p1072_p13 }
 0x3f9   : > { %v713_v46 = vpop.permute.xlu1 %712 }
 0x3fa   : > { %v722_v49 = vsel %vm269_vm3, %v376_v47, %v713_v46 }
 0x401   : > { %v716_v48 = vpop.permute.xlu0 %715 }
 0x402   : > { %v724_v50 = vsel %vm219_vm0, %v722_v49, %v716_v48 }
 0x426   : > { %v719_v51 = vpop.permute.xlu1 %718 }
 0x427   : > { %v727_v52 = vsel %vm725_vm5, %v724_v50, %v719_v51 }
 0x428   : > { %991 = vmatmul.mubr.msk.bf16.vlgmr.msra.gmra.mxu1 %vm767_vm6, %v727_v52 }
 0x4e8   : > { %v804_v54 = vpop.f32.mrf.mxu1 }
 0x4e9   : > { %v805_v55 = vadd.f32 %v903_v53, %v804_v54 }
 0x4ea   : > { %v992_v56 = vpop.f32.mrf.mxu1 }
 0x4eb   : > { %810 = vst.msk [vmem:[%s188_s23] sm:$0xff] %vm219_vm0, %v805_v55 }
 0x4ec   : > { %v807_v57 = vpop.f32.mrf.mxu1 }
 0x4ed   : > { %1082 = shalt.err (!%p1079_p3)
}
 0x4ee   : > { %s1083_s9 = scalar_lea.hbm %s1327_s30, 128  ;;  %s1087_s12 = scalar_lea.hbm %s1373_s4, 256 }
 0x4ef   : > { %p1084_p4 = scmp.ne.s32.totalorder %s1327_s30, %s1083_s9  ;;  %p1088_p9 = scmp.lt.s32.totalorder %s1327_s30, %s1373_s4 }
 0x4f0   : > { %p1089_p10 = scmp.lt.s32.totalorder %s1087_s12, %s1083_s9 }
 0x4f1   : > { %p1085_p7 = pnand %p1084_p4, %p1205_p5 }
 0x4f2   : > { %p1090_p11 = por %p1089_p10, %p1088_p9 }
 0x4f3   : > { %p1086_p8 = pneg %p1085_p7 }
 0x4f5   : > { %p1091_p12 = pnand %p1090_p11, %p1086_p8 }
 0x4f7   : > { %1094 = shalt.err (!%p1091_p12)
}
 0x4f8   : > { %994 = dma.vmem_to_hbm [thread:$0]  (%p1205_p5), %s1329_s27, 128, %s1327_s30, %s812_s5   ;;  %v993_v58 = vpop.f32.mrf.mxu1 }
 0x4f9 PF: > { %p1000_p13 = scmp.ge.s32.totalorder %s1129_s18, 2  ;;  %s837_s20 = sand.u32 1, %s1117_s15  }
 0x4fa   : > { %s838_s22 = scalar_lea.sflag [#allocation3], %s837_s20 }
 0x4fb   : > { %p997_p0 = pnand %p1000_p13, %p1209_p6 }
 0x4fd   : > { %p998_p1 = pneg %p997_p0 }
 0x4ff   : > { %1112 = dma.done.wait (%p998_p1), %s838_s22, 128  }
 0x500   : > { %1114 = vsyncadd (%p998_p1), %s838_s22, 4294967168  ;;  %p14_p2 = scmp.ge.s32.totalorder %s1192_s21, 4   ;;  %s1376_s15 = smov %s1121_s16 }
 0x501   : > { %s1377_s16 = smov %s1125_s17  ;;  %s1378_s17 = smov %s1203_s24 }
 0x502   : > { %s1379_s18 = smov %s1192_s21  ;;  %16 = sbr.rel (!%p14_p2) target bundleno = 3 (0x3), region = 71 }
 0x507   :  { %843 = vsyncpa [#allocation3], 1 }
 0x508   :  { %845 = vsyncpa [#allocation3 + $0x1], 1 }

</bundles_post_ra>
